<compile_context>
chip_gen: v7x
topology: tpu7x:2x2x1
jax: 0.10.0
libtpu: 0.0.40
codegen_flags: <defaults>
</compile_context>

<pallas_src>
import functools

import jax
import jax.numpy as jnp
from jax.experimental import pallas as pl
from jax.experimental.pallas import tpu as pltpu


def _get_filter_kernel(*refs, K, has_l):
    if has_l:
        x_ref, l_ref, w_ref, b_ref, o_ref = refs
    else:
        x_ref, w_ref, b_ref, o_ref = refs
        l_ref = None

    nb = x_ref.shape[0]
    f32 = jnp.float32
    w = w_ref[...]                          # (K*Fin, Fout), k-major rows
    b = b_ref[...].astype(f32)              # (1, Fout)

    for n in range(nb):                     # nb is small & static -> unrolled
        x0 = x_ref[n]                       # (M, Fin), native dtype
        if has_l:
            L = l_ref[n]                    # (M, M), native dtype
            # T1 = L @ T0   (f32 accumulation on the MXU, keep native dtype)
            x1 = jnp.dot(L, x0, preferred_element_type=f32).astype(x0.dtype)
            terms = [x0, x1]
            for _ in range(2, K):
                # Tk = 2 L T_{k-1} - T_{k-2}
                x2 = (2.0 * jnp.dot(L, x1, preferred_element_type=f32)
                      - x0.astype(f32)).astype(x0.dtype)
                terms.append(x2)
                x0, x1 = x1, x2
            # Lane-concat -> (M, K*Fin) slab; column index = k*Fin + fin,
            # matching the k-major re-layout of W done in the wrapper.
            slab = jnp.concatenate(terms, axis=-1)
        else:
            slab = x0                       # K == 1: project x only

        acc = jnp.dot(slab, w, preferred_element_type=f32)    # (M, Fout) f32
        out = jnp.maximum(acc + b, 0.0)     # fused bias + ReLU
        o_ref[n] = out.astype(o_ref.dtype)


def _choose_block_n(N, M, Fin, Fout, K, itemsize):
    """How many batch elements to process per grid step."""
    per_elem_bytes = (M * Fin + (M * M if K > 1 else 0) + M * Fout) * itemsize
    # Conservative block budget that fits every generation's scoped VMEM
    # once double-buffered by the pipeline.
    vmem_budget = 24 << 20
    nb_vmem = max(1, vmem_budget // (2 * per_elem_bytes))
    flops_per_elem = 2 * (K - 1) * M * M * Fin + 2 * K * M * Fin * Fout
    nb_flops = max(1, -(-8_000_000 // max(flops_per_elem, 1)))  # ceil div
    nb = int(min(N, nb_vmem, nb_flops, 8))
    # Keep at least two grid steps when possible so the v7x megacore can
    # split the "parallel" batch axis across its two TensorCores.
    if N >= 2:
        nb = min(nb, max(1, N // 2))
    return max(1, nb)


def get_filter(x, L, W, B, *, K, block_n=None):
    """Pallas equivalent of GetFilter.forward.

    x: (N, M, Fin)   L: (N, M, M)   W: (K*Fin, Fout)   B: (Fout,)
    returns (N, M, Fout)
    """
    N, M, Fin = x.shape
    KF, Fout = W.shape
    assert KF == K * Fin, (KF, K, Fin)

    # PyTorch flattens the permuted (Fin, K) axes row-major, so W's row index
    # is fin*K + k.  Re-lay W k-major (row index k*Fin + fin) so it matches
    # the in-kernel lane-concatenation [T0 | T1 | ... | T_{K-1}].
    w_km = W.reshape(Fin, K, Fout).transpose(1, 0, 2).reshape(K * Fin, Fout)
    b2 = B.reshape(1, Fout)

    x_is = jnp.dtype(x.dtype).itemsize
    l_is = jnp.dtype(L.dtype).itemsize
    w_is = jnp.dtype(W.dtype).itemsize
    b_is = jnp.dtype(B.dtype).itemsize

    nb = block_n if block_n is not None else _choose_block_n(
        N, M, Fin, Fout, K, x_is)
    n_pad = (-N) % nb
    if n_pad:
        x = jnp.pad(x, ((0, n_pad), (0, 0), (0, 0)))
        if K > 1:
            L = jnp.pad(L, ((0, n_pad), (0, 0), (0, 0)))
    Np = N + n_pad
    grid = (Np // nb,)

    in_specs = [pl.BlockSpec((nb, M, Fin), lambda i: (i, 0, 0))]
    inputs = [x]
    if K > 1:
        in_specs.append(pl.BlockSpec((nb, M, M), lambda i: (i, 0, 0)))
        inputs.append(L)
    in_specs += [
        pl.BlockSpec((K * Fin, Fout), lambda i: (0, 0)),
        pl.BlockSpec((1, Fout), lambda i: (0, 0)),
    ]
    inputs += [w_km, b2]

    # Honest scheduling hint: per-operand itemsizes, no L traffic when K == 1.
    flops = 2 * Np * (K - 1) * M * M * Fin + 2 * Np * M * (K * Fin) * Fout
    bytes_accessed = (Np * M * Fin * x_is
                      + (Np * M * M * l_is if K > 1 else 0)
                      + K * Fin * Fout * w_is + Fout * b_is
                      + Np * M * Fout * x_is)

    # VMEM: double-buffered input/output blocks + resident weights + margin.
    block_bytes = 2 * nb * ((M * Fin + (M * M if K > 1 else 0)) * x_is
                            + M * Fout * x_is)
    needed = block_bytes + K * Fin * Fout * w_is + Fout * b_is + (4 << 20)
    vmem_limit = int(min(64 << 20, max(32 << 20, needed)))

    out = pl.pallas_call(
        functools.partial(_get_filter_kernel, K=K, has_l=(K > 1)),
        out_shape=jax.ShapeDtypeStruct((Np, M, Fout), x.dtype),
        grid_spec=pltpu.PrefetchScalarGridSpec(
            num_scalar_prefetch=0,
            grid=grid,
            in_specs=in_specs,
            out_specs=pl.BlockSpec((nb, M, Fout), lambda i: (i, 0, 0)),
        ),
        compiler_params=pltpu.CompilerParams(
            dimension_semantics=("parallel",),
            vmem_limit_bytes=vmem_limit,
        ),
        cost_estimate=pl.CostEstimate(
            flops=flops, transcendentals=0, bytes_accessed=bytes_accessed),
    )(*inputs)

    return out[:N] if n_pad else out


def _get_filter_ref(x, L, W, B, K):
    """Pure-JAX reference mirroring the PyTorch module exactly."""
    N, M, Fin = x.shape
    x0 = x
    terms = [x0]
    if K > 1:
        x1 = jnp.einsum("nij,njf->nif", L, x0)
        terms.append(x1)
        for _ in range(2, K):
            x2 = 2.0 * jnp.einsum("nij,njf->nif", L, x1) - x0
            terms.append(x2)
            x0, x1 = x1, x2
    xs = jnp.stack(terms, axis=0)               # (K, N, M, Fin)
    xs = jnp.transpose(xs, (1, 2, 3, 0))        # (N, M, Fin, K)
    xs = xs.reshape(N * M, Fin * K)
    y = xs @ W + B
    return jnp.maximum(y, 0.0).reshape(N, M, W.shape[1])


def _run_case(key, N, M, Fin, K, Fout, block_n=None):
    k1, k2, k3, k4 = jax.random.split(key, 4)
    x = jax.random.normal(k1, (N, M, Fin), dtype=jnp.float32)
    L = jax.random.normal(k2, (N, M, M), dtype=jnp.float32) * 0.05
    W = jax.random.normal(k3, (K * Fin, Fout), dtype=jnp.float32) * 0.2
    B = jax.random.normal(k4, (Fout,), dtype=jnp.float32) * 0.2

    out = jax.block_until_ready(get_filter(x, L, W, B, K=K, block_n=block_n))
    ref = _get_filter_ref(x, L, W, B, K)
    assert out.shape == (N, M, Fout), out.shape
    assert jnp.allclose(out, ref, atol=2e-2, rtol=2e-2), (
        f"mismatch vs reference (N={N}, M={M}, Fin={Fin}, K={K}, Fout={Fout})")


if __name__ == "__main__":
    key = jax.random.PRNGKey(0)
    keys = jax.random.split(key, 3)

    # Main case (small, TPU-layout-friendly shapes).
    _run_case(keys[0], N=2, M=128, Fin=32, K=3, Fout=128)
    # K == 1 path: L is never declared nor DMA'd.
    _run_case(keys[1], N=2, M=128, Fin=32, K=1, Fout=128)
    # Batched grid step with batch padding (N=3 packed two-per-step).
    _run_case(keys[2], N=3, M=128, Fin=32, K=3, Fout=128, block_n=2)

    print("KERNEL_OK")
</pallas_src>

<mosaic_0001>
module attributes {stable_mosaic.version = 11 : i64} {
  func.func @_get_filter_kernel(%arg0: i32, %arg1: memref<1x128x32xf32, #tpu.memory_space<vmem>>, %arg2: memref<1x128x128xf32, #tpu.memory_space<vmem>>, %arg3: memref<96x128xf32, #tpu.memory_space<vmem>>, %arg4: memref<1x128xf32, #tpu.memory_space<vmem>>, %arg5: memref<1x128x128xf32, #tpu.memory_space<vmem>>) attributes {dimension_semantics = [#tpu.dimension_semantics<parallel>], iteration_bounds = array<i64: 2>, scalar_prefetch = 0 : i64, scratch_operands = 0 : i64, tpu.core_type = #tpu.core_type<tc>, window_params = [{transform_indices = @transform_0, window_bounds = array<i64: 1, 128, 32>}, {transform_indices = @transform_1, window_bounds = array<i64: 1, 128, 128>}, {pipeline_mode = #tpu.pipeline_mode<synchronous>, transform_indices = @transform_2, window_bounds = array<i64: 96, 128>}, {pipeline_mode = #tpu.pipeline_mode<synchronous>, transform_indices = @transform_3, window_bounds = array<i64: 1, 128>}, {transform_indices = @transform_4, window_bounds = array<i64: 1, 128, 128>}]} {
    %c0 = arith.constant 0 : index
    %c0_0 = arith.constant 0 : index
    %0 = vector.load %arg3[%c0, %c0_0] : memref<96x128xf32, #tpu.memory_space<vmem>>, vector<96x128xf32>
    %c0_1 = arith.constant 0 : index
    %c0_2 = arith.constant 0 : index
    %1 = vector.load %arg4[%c0_1, %c0_2] : memref<1x128xf32, #tpu.memory_space<vmem>>, vector<1x128xf32>
    %c0_3 = arith.constant 0 : index
    %c0_4 = arith.constant 0 : index
    %c0_5 = arith.constant 0 : index
    %2 = vector.load %arg1[%c0_3, %c0_4, %c0_5] : memref<1x128x32xf32, #tpu.memory_space<vmem>>, vector<1x128x32xf32>
    %3 = vector.shape_cast %2 : vector<1x128x32xf32> to vector<128x32xf32>
    %c0_6 = arith.constant 0 : index
    %c0_7 = arith.constant 0 : index
    %c0_8 = arith.constant 0 : index
    %4 = vector.load %arg2[%c0_6, %c0_7, %c0_8] : memref<1x128x128xf32, #tpu.memory_space<vmem>>, vector<1x128x128xf32>
    %5 = vector.shape_cast %4 : vector<1x128x128xf32> to vector<128x128xf32>
    %cst = arith.constant dense<0.000000e+00> : vector<128x32xf32>
    %6 = tpu.matmul %5, %3, %cst {dimension_numbers = #tpu.dot_dimension_numbers<[1], [0], [0], [1], [0, 0, 1, 1], [], []>} : vector<128x128xf32>, vector<128x32xf32>, vector<128x32xf32> -> vector<128x32xf32>
    %cst_9 = arith.constant dense<0.000000e+00> : vector<128x32xf32>
    %7 = tpu.matmul %5, %6, %cst_9 {dimension_numbers = #tpu.dot_dimension_numbers<[1], [0], [0], [1], [0, 0, 1, 1], [], []>} : vector<128x128xf32>, vector<128x32xf32>, vector<128x32xf32> -> vector<128x32xf32>
    %cst_10 = arith.constant 2.000000e+00 : f32
    %8 = vector.broadcast %cst_10 : f32 to vector<128x32xf32>
    %9 = arith.mulf %8, %7 : vector<128x32xf32>
    %10 = arith.subf %9, %3 : vector<128x32xf32>
    %11 = tpu.concatenate %3, %6, %10 in 1 : vector<128x32xf32>, vector<128x32xf32>, vector<128x32xf32> -> vector<128x96xf32>
    %cst_11 = arith.constant dense<0.000000e+00> : vector<128x128xf32>
    %12 = tpu.matmul %11, %0, %cst_11 {dimension_numbers = #tpu.dot_dimension_numbers<[1], [0], [0], [1], [0, 0, 1, 1], [], []>} : vector<128x96xf32>, vector<96x128xf32>, vector<128x128xf32> -> vector<128x128xf32>
    %13 = vector.broadcast %1 : vector<1x128xf32> to vector<128x128xf32>
    %14 = arith.addf %12, %13 : vector<128x128xf32>
    %cst_12 = arith.constant 0.000000e+00 : f32
    %15 = vector.broadcast %cst_12 : f32 to vector<128x128xf32>
    %16 = arith.maximumf %14, %15 : vector<128x128xf32>
    %c0_13 = arith.constant 0 : index
    %c0_14 = arith.constant 0 : index
    %c0_15 = arith.constant 0 : index
    %17 = vector.load %arg5[%c0_13, %c0_14, %c0_15] : memref<1x128x128xf32, #tpu.memory_space<vmem>>, vector<1x128x128xf32>
    %18 = vector.shape_cast %17 : vector<1x128x128xf32> to vector<128x128xf32>
    %19 = vector.shape_cast %16 : vector<128x128xf32> to vector<1x128x128xf32>
    tpu.vector_store %arg5[%c0_13, %c0_14, %c0_15], %19 {strides = array<i32>} : memref<1x128x128xf32, #tpu.memory_space<vmem>>, vector<1x128x128xf32>,
    return
  }
  func.func @transform_0(%arg0: i32) -> (i32, i32, i32) {
    %c0_i32 = arith.constant 0 : i32
    %c0_i32_0 = arith.constant 0 : i32
    %c0_i32_1 = arith.constant 0 : i32
    return %arg0, %c0_i32, %c0_i32_0 : i32, i32, i32
  }
  func.func @transform_1(%arg0: i32) -> (i32, i32, i32) {
    %c0_i32 = arith.constant 0 : i32
    %c0_i32_0 = arith.constant 0 : i32
    %c0_i32_1 = arith.constant 0 : i32
    return %arg0, %c0_i32, %c0_i32_0 : i32, i32, i32
  }
  func.func @transform_2(%arg0: i32) -> (i32, i32) {
    %c0_i32 = arith.constant 0 : i32
    %c0_i32_0 = arith.constant 0 : i32
    %c0_i32_1 = arith.constant 0 : i32
    return %c0_i32, %c0_i32_0 : i32, i32
  }
  func.func @transform_3(%arg0: i32) -> (i32, i32) {
    %c0_i32 = arith.constant 0 : i32
    %c0_i32_0 = arith.constant 0 : i32
    %c0_i32_1 = arith.constant 0 : i32
    return %c0_i32, %c0_i32_0 : i32, i32
  }
  func.func @transform_4(%arg0: i32) -> (i32, i32, i32) {
    %c0_i32 = arith.constant 0 : i32
    %c0_i32_0 = arith.constant 0 : i32
    %c0_i32_1 = arith.constant 0 : i32
    return %arg0, %c0_i32, %c0_i32_0 : i32, i32, i32
  }
}

</mosaic_0001>

<bundles_post_ra>
// kernel: tpu_custom_call.1
= control target key start
LH: loop header
LB: loop body
LE: loop exit
PB: predicated region body
PF: predicated region fallthrough
CT: control target
= control target key end

     0   :  { %9 = vsyncpa [#allocation3], 0  ;;  %s2106_s0 = inlined_call_operand.vmem [shape: f32[2,128,32], index: 0, kind: input, shape index: {}]   ;;  %s2107_s1 = inlined_call_operand.vmem [shape: f32[2,128,128], index: 1, kind: input, shape index: {}]   ;;  %s2108_s2 = inlined_call_operand.hbm [shape: f32[96,128], index: 2, kind: input, shape index: {}]   ;;  %s2109_s3 = inlined_call_operand.vmem [shape: f32[1,128], index: 3, kind: input, shape index: {}]   ;;  %s2110_s4 = inlined_call_operand.hbm [shape: f32[2,128,128], index: 4, kind: output, shape index: {}]  }
   0x1   :  { %10 = vsyncpa [#allocation4], 0 }
   0x2   :  { %12 = vsyncpa [#allocation4 + $0x1], 0  ;;  %s1665_s15 = smov 0   ;;  %s1667_s16 = smov 0  }
   0x3   :  { %s1669_s17 = smov 0   ;;  %s1671_s18 = smov 0  }
   0x4 LB: > { %s1686_s19 = sadd.s32 4294967295, %s1630_s18   ;;  %s1092_s20 = sadd.s32 4294967294, %s1630_s18   ;;  %s1630_s18 = sphi %s1671_s18, %s2126_s18   ;;  %s1626_s17 = sphi %s1669_s17, %s2125_s17   ;;  %s1622_s16 = sphi %s1667_s16, %s2124_s16   ;;  %s1618_s15 = sphi %s1665_s15, %s2123_s15  }
   0x5   : > { %s1690_s21 = sadd.s32 1, %s1630_s18   ;;  %s119_s22 = sadd.s32 1, %s1626_s17 }
   0x6   : > { %s116_s23 = ssub.s32 %s1630_s18, %s1690_s21  ;;  %p129_p0 = scmp.ne.s32.totalorder %s1626_s17, %s1622_s16 }
   0x7   : > { %p117_p1 = scmp.eq.s32.totalorder %s116_s23, 0  ;;  %p130_p2 = scmp.eq.s32.totalorder %s1686_s19, 1 }
   0x8   : > { %p135_p3 = scmp.ne.s32.totalorder %s1622_s16, %s1618_s15  ;;  %p136_p4 = scmp.eq.s32.totalorder %s1092_s20, 1 }
   0x9   : > { %s1701_s24 = scalar_select %p117_p1, %s1626_s17, %s119_s22  }
   0xa   : > { %p1703_p5 = por %p130_p2, %p129_p0  ;;  %p1707_p6 = por %p136_p4, %p135_p3 }
   0xb   : > { %p1093_p7 = scmp.ge.s32.totalorder %s1630_s18, 1  ;;  %p143_p8 = scmp.lt.s32.totalorder %s1630_s18, 3 }
   0xc   : > { %s2114_s25 = scalar_select %p1703_p5, 1, 0 }
   0xd   : > { %s2115_s26 = scalar_select %p1707_p6, 1, 0 }
   0xe   : > { %p2111_p9 = scmp.eq.s32.totalorder %s1686_s19, 0  ;;  %p1714_p10 = pnand %p1093_p7, %p143_p8 }
   0xf   : > { %s1632_s28 = smov [#allocation2]   ;;  %s1536_s7 = scalar_lea.hbm %s2108_s2, 1536 }
  0x10   : > { %s2116_s27 = scalar_select %p1714_p10, 1, 0 }
  0x11   : > { %s155_s29 = sshll.u32 %s1632_s28, 4  ;;  %p1486_p11 = pneg %p1714_p10  ;;  %s156_s29 = int_to_ptr.vmem [resolvable:$true] %s155_s29 }
  0x12   : > { %p1537_p13 = scmp.ne.s32.totalorder %s2108_s2, %s1536_s7  ;;  %p1543_p3 = scmp.lt.u32.totalorder %s1536_s7, %s2108_s2 }
  0x13   : > { %p1722_p12 = pnand %p2111_p9, %p1486_p11 }
  0x15   : > { %p1538_p0 = pneg %p1722_p12 }
  0x17   : > { %p1539_p1 = pnand %p1538_p0, %p1537_p13 }
  0x19   : > { %p1540_p2 = pneg %p1539_p1 }
  0x1b   : > { %p1545_p4 = pnand %p1543_p3, %p1540_p2 }
  0x1d   : > { %1548 = shalt.err (!%p1545_p4)
}
  0x1e   : > { %s1549_s12 = scalar_lea.vmem %s156_s29, 1536  ;;  %p1557_p9 = scmp.lt.s32.totalorder %s156_s29, %s156_s29 }
  0x1f   : > { %p1550_p7 = scmp.ne.s32.totalorder %s156_s29, %s1549_s12  ;;  %p1558_p6 = scmp.lt.s32.totalorder %s1549_s12, %s1549_s12 }
  0x21   : > { %p1552_p8 = pnand %p1550_p7, %p1538_p0  ;;  %p1559_p5 = por %p1558_p6, %p1557_p9 }
  0x23   : > { %p1553_p11 = pneg %p1552_p8 }
  0x25   : > { %p1560_p10 = pnand %p1559_p5, %p1553_p11 }
  0x27   : > { %1563 = shalt.err (!%p1560_p10)
}
  0x28   : > { %s1633_s13 = smov 128   ;;  %s1634_s14 = smov 8  }
  0x29   : > { %1489 = dma.hbm_to_vmem [thread:$0]  (!%p1722_p12), %s2108_s2, 1536, %s156_s29, [#allocation3], %s1633_s13, %s1633_s13, %s1634_s14  }
  0x2a   : > { %p2118_p13 = scmp.ne.s32.totalorder %s2116_s27, 0 }
  0x2b   : > { %p2119_p1 = scmp.eq.s32.totalorder (!%p2118_p13), %s1686_s19, 0 }
  0x2c   : > { %190 = sbr.rel (%p2118_p13) target bundleno = 948 (0x3b4), region = 36 }
  0x33   : > { %1609 = dma.done.wait (%p2119_p1), [#allocation3], 1536   ;;  %p2120_p0 = pmov %p2119_p1 }
  0x34   : > { %p221_p5 = scmp.lt.s32.totalorder %s1686_s19, 1  ;;  %s1635_s8 = smov 32   ;;  %vm726_vm0 = vcmask 261120   ;;  %vm743_vm1 = vcmask 523264   ;;  %vm766_vm2 = vcmask 785408  }
  0x35   : > { %1611 = vsyncadd (%p2120_p0), [#allocation3], 4294965760  ;;  %s1636_s9 = smov 64   ;;  %s218_s10 = sand.u32 1, %s1622_s16  }
  0x36   : > { %s222_s23 = scalar_select %p221_p5, %s1686_s19, 1 }
  0x37   : > { %s1098_s13 = sshll.u32 %s218_s10, 7  ;;  %s1127_s20 = sshll.u32 %s1686_s19, 11 }
  0x38   : > { %s1125_s28 = sshll.u32 %s222_s23, 7  ;;  %s2022_s14 = scalar_lea.vmem [#allocation5], %s1098_s13 }
  0x39   : > { %s1753_s6 = scalar_lea.vmem %s2106_s0, %s1125_s28  ;;  %s1780_s7 = scalar_lea.vmem %s2107_s1, %s1125_s28 }
  0x3a   : > { %v1756_v0 = vld [vmem:[%s1753_s6] sm:$0xff]  ;;  %v1759_v1 = vld [vmem:[%s1753_s6 + $0x8] sm:$0xff]  ;;  %v1762_v2 = vld [vmem:[%s1753_s6 + $0x10] sm:$0xff]  ;;  %s1006_s22 = sshll.u32 %s2022_s14, 4  ;;  %s2057_s5 = scalar_lea.hbm %s2110_s4, %s1127_s20  ;;  %s2059_s22 = int_to_ptr.vmem [resolvable:$true] %s1006_s22 }
  0x3b   : > { %v1380_v3 = vpack.c.bf16 %v1759_v1, %v1756_v0  ;;  %v1767_v4 = vld [vmem:[%s1753_s6 + $0x18] sm:$0xff]  ;;  %v1772_v6 = vld [vmem:[%s1753_s6 + $0x20] sm:$0xff]  ;;  %v1775_v7 = vld [vmem:[%s1753_s6 + $0x28] sm:$0xff]  ;;  %s2065_s19 = scalar_lea.sflag [#allocation4], %s218_s10  ;;  %s1564_s30 = scalar_lea.vmem %s2059_s22, 2048 }
  0x3c   : > { %v1384_v5 = vpack.c.bf16 %v1767_v4, %v1762_v2  ;;  %v1388_v8 = vpack.c.bf16 %v1775_v7, %v1772_v6  ;;  %v260_v9 = vld [vmem:[%s1780_s7] sm:$0xff]  ;;  %v1786_v10 = vld [vmem:[%s1753_s6 + $0x30] sm:$0xff]  ;;  %v1789_v11 = vld [vmem:[%s1753_s6 + $0x38] sm:$0xff]  ;;  %p1565_p6 = scmp.ne.s32.totalorder %s2059_s22, %s1564_s30  ;;  %p2121_p9 = scmp.ne.s32.totalorder %s2114_s25, 0 }
  0x3d   : > { %1381 = vmatprep.subr.bf16.mxu0 %v1380_v3  ;;  %1252 = vmatprep.mubr.f32.mxu0 %v260_v9  ;;  %v1392_v12 = vpack.c.bf16 %v1789_v11, %v1786_v10  ;;  %v1794_v13 = vld [vmem:[%s1753_s6 + $0x40] sm:$0xff]  ;;  %v1797_v14 = vld [vmem:[%s1753_s6 + $0x48] sm:$0xff]  ;;  %v1802_v16 = vld [vmem:[%s1753_s6 + $0x50] sm:$0xff] }
  0x3e   : > { %1383 = vmatpush3.bf16.msra.mxu0 %v1380_v3  ;;  %1308 = vmatprep.mubr.f32.mxu1 %v260_v9  ;;  %v1396_v15 = vpack.c.bf16 %v1797_v14, %v1794_v13  ;;  %v1805_v17 = vld [vmem:[%s1753_s6 + $0x58] sm:$0xff]  ;;  %v1810_v19 = vld [vmem:[%s1753_s6 + $0x60] sm:$0xff]  ;;  %v1813_v20 = vld [vmem:[%s1753_s6 + $0x68] sm:$0xff]  ;;  %p1566_p10 = pnand %p1565_p6, %p2121_p9 }
  0x3f   : > { %1385 = vmatprep.subr.bf16.mxu0 %v1384_v5  ;;  %v1400_v18 = vpack.c.bf16 %v1805_v17, %v1802_v16  ;;  %v1404_v21 = vpack.c.bf16 %v1813_v20, %v1810_v19  ;;  %v1818_v22 = vld [vmem:[%s1753_s6 + $0x70] sm:$0xff]  ;;  %v1821_v23 = vld [vmem:[%s1753_s6 + $0x78] sm:$0xff]  ;;  %v1826_v25 = vld [vmem:[%s1780_s7 + $0x8] sm:$0xff]  ;;  %s1637_s6 = smov [#allocation5]  }
  0x40   : > { %v1408_v24 = vpack.c.bf16 %v1821_v23, %v1818_v22  ;;  %v1829_v26 = vld [vmem:[%s1780_s7 + $0x10] sm:$0xff]  ;;  %v1834_v27 = vld [vmem:[%s1780_s7 + $0x18] sm:$0xff]  ;;  %v1837_v28 = vld [vmem:[%s1780_s7 + $0x20] sm:$0xff]  ;;  %p1567_p12 = pneg %p1566_p10  ;;  %s1568_s27 = sshll.u32 %s1637_s6, 4  ;;  %s1569_s27 = int_to_ptr.vmem [resolvable:$false] %s1568_s27 }
  0x41   : > { %v1842_v29 = vld [vmem:[%s1780_s7 + $0x28] sm:$0xff]  ;;  %v1845_v30 = vld [vmem:[%s1780_s7 + $0x30] sm:$0xff]  ;;  %v1850_v31 = vld [vmem:[%s1780_s7 + $0x38] sm:$0xff]  ;;  %s1570_s29 = scalar_lea.vmem %s1569_s27, 4096  ;;  %p1571_p2 = scmp.lt.s32.totalorder %s2059_s22, %s1569_s27 }
  0x42   : > { %1387 = vmatpush3.bf16.msra.mxu0 %v1384_v5  ;;  %v1853_v32 = vld [vmem:[%s1780_s7 + $0x40] sm:$0xff]  ;;  %v1858_v33 = vld [vmem:[%s1780_s7 + $0x48] sm:$0xff]  ;;  %v1861_v34 = vld [vmem:[%s1780_s7 + $0x50] sm:$0xff]  ;;  %p1572_p3 = scmp.lt.s32.totalorder %s1570_s29, %s1564_s30 }
  0x43   : > { %1389 = vmatprep.subr.bf16.mxu0 %v1388_v8  ;;  %v1866_v35 = vld [vmem:[%s1780_s7 + $0x58] sm:$0xff]  ;;  %v1869_v36 = vld [vmem:[%s1780_s7 + $0x60] sm:$0xff]  ;;  %v1874_v37 = vld [vmem:[%s1780_s7 + $0x68] sm:$0xff] }
  0x44   : > { %v1877_v38 = vld [vmem:[%s1780_s7 + $0x70] sm:$0xff]  ;;  %v1882_v39 = vld [vmem:[%s1780_s7 + $0x78] sm:$0xff]  ;;  %v231_v3 = vld [vmem:[#allocation2] sm:$0xff]  ;;  %p1573_p4 = por %p1572_p3, %p1571_p2 }
  0x45   : > { %v232_v5 = vld [vmem:[#allocation2 + $0x8] sm:$0xff] }
  0x46   : > { %1391 = vmatpush3.bf16.msra.mxu0 %v1388_v8  ;;  %v233_v8 = vld [vmem:[#allocation2 + $0x10] sm:$0xff]  ;;  %v1444_v9 = vpack.c.bf16 %v232_v5, %v231_v3  ;;  %p1574_p7 = pnand %p1573_p4, %p1567_p12 }
  0x47   : > { %1393 = vmatprep.subr.bf16.mxu0 %v1392_v12 }
  0x4a   : > { %1395 = vmatpush3.bf16.msra.mxu0 %v1392_v12  ;;  %v234_v12 = vld [vmem:[#allocation2 + $0x18] sm:$0xff] }
  0x4b   : > { %1397 = vmatprep.subr.bf16.mxu0 %v1396_v15 }
  0x4e   : > { %1399 = vmatpush3.bf16.msra.mxu0 %v1396_v15  ;;  %v1448_v15 = vpack.c.bf16 %v234_v12, %v233_v8 }
  0x4f   : > { %1401 = vmatprep.subr.bf16.mxu0 %v1400_v18 }
  0x52   : > { %1403 = vmatpush3.bf16.msra.mxu0 %v1400_v18  ;;  %v235_v18 = vld [vmem:[#allocation2 + $0x20] sm:$0xff] }
  0x53   : > { %1405 = vmatprep.subr.bf16.mxu0 %v1404_v21 }
  0x56   : > { %1407 = vmatpush3.bf16.msra.mxu0 %v1404_v21  ;;  %v236_v21 = vld [vmem:[#allocation2 + $0x28] sm:$0xff] }
  0x57   : > { %1409 = vmatprep.subr.bf16.mxu0 %v1408_v24 }
  0x5a   : > { %1411 = vmatpush3.bf16.msra.mxu0 %v1408_v24  ;;  %v1452_v24 = vpack.c.bf16 %v236_v21, %v235_v18 }
  0x5b   : > { %1445 = vmatprep.subr.bf16.mxu0 %v1444_v9 }
  0x5d   : > { %1253 = vmatmul.mubr.f32.vlgmr.msra.gmra.mrb[0].mxu0 %v1826_v25 }
  0x5e   : > { %1255 = vmatprep.mubr.f32.mxu0 %v1829_v26  ;;  %1447 = vmatpush3.bf16.msra.mxu0 %v1444_v9 }
  0x5f   : > { %1449 = vmatprep.subr.bf16.mxu0 %v1448_v15 }
  0x61   : > { %1256 = vmatmul.mubr.f32.gmra.mrb[2].mxu0 %v1834_v27 }
  0x62   : > { %1258 = vmatprep.mubr.f32.mxu0 %v1837_v28  ;;  %1451 = vmatpush3.bf16.msra.mxu0 %v1448_v15 }
  0x63   : > { %1453 = vmatprep.subr.bf16.mxu0 %v1452_v24 }
  0x65   : > { %1259 = vmatmul.mubr.f32.gmra.mrb[4].mxu0 %v1842_v29 }
  0x66   : > { %1261 = vmatprep.mubr.f32.mxu0 %v1845_v30  ;;  %1455 = vmatpush3.bf16.msra.mxu0 %v1452_v24 }
  0x69   : > { %1262 = vmatmul.mubr.f32.gmra.mrb[6].mxu0 %v1850_v31 }
  0x6a   : > { %1264 = vmatprep.mubr.f32.mxu0 %v1853_v32 }
  0x6d   : > { %1265 = vmatmul.mubr.f32.gmra.mrb[8].mxu0 %v1858_v33 }
  0x6e   : > { %1267 = vmatprep.mubr.f32.mxu0 %v1861_v34 }
  0x71   : > { %1268 = vmatmul.mubr.f32.gmra.mrb[10].mxu0 %v1866_v35 }
  0x72   : > { %1270 = vmatprep.mubr.f32.mxu0 %v1869_v36 }
  0x75   : > { %1271 = vmatmul.mubr.f32.gmra.mrb[12].mxu0 %v1874_v37 }
  0x76   : > { %1273 = vmatprep.mubr.f32.mxu0 %v1877_v38 }
  0x79   : > { %1274 = vmatmul.mubr.f32.gmra.mrb[14].mxu0 %v1882_v39 }
 0x130   : > { %v1254_v40 = vpop.f32.mrb[0].mxu0 }
 0x131   : > { %616 = vrot.lane.b32.xlu1 %v1254_v40, %s1635_s8  ;;  %v342_v41 = vpop.f32.mrb[1].mxu0 }
 0x132   : > { %614 = vrot.lane.b32.xlu0 %v342_v41, %s1635_s8  ;;  %v1412_v42 = vpack.c.bf16 %v1254_v40, %v342_v41 }
 0x134   : > { %v1257_v43 = vpop.f32.mrb[2].mxu0  ;;  %1413 = vmatprep.subr.bf16.mxu1 %v1412_v42 }
 0x135   : > { %v352_v44 = vpop.f32.mrb[3].mxu0  ;;  %1415 = vmatpush3.bf16.msra.mxu1 %v1412_v42 }
 0x136   : > { %v1416_v45 = vpack.c.bf16 %v1257_v43, %v352_v44  ;;  %620 = vrot.lane.b32.xlu0 %v1257_v43, %s1635_s8 }
 0x138   : > { %v1260_v46 = vpop.f32.mrb[4].mxu0  ;;  %1417 = vmatprep.subr.bf16.mxu1 %v1416_v45 }
 0x139   : > { %v362_v47 = vpop.f32.mrb[5].mxu0  ;;  %1419 = vmatpush3.bf16.msra.mxu1 %v1416_v45 }
 0x13a   : > { %v1420_v48 = vpack.c.bf16 %v1260_v46, %v362_v47  ;;  %618 = vrot.lane.b32.xlu0 %v352_v44, %s1635_s8 }
 0x13c   : > { %v1263_v49 = vpop.f32.mrb[6].mxu0  ;;  %1421 = vmatprep.subr.bf16.mxu1 %v1420_v48 }
 0x13d   : > { %v372_v50 = vpop.f32.mrb[7].mxu0  ;;  %1423 = vmatpush3.bf16.msra.mxu1 %v1420_v48 }
 0x13e   : > { %v1424_v51 = vpack.c.bf16 %v1263_v49, %v372_v50  ;;  %624 = vrot.lane.b32.xlu0 %v1260_v46, %s1635_s8 }
 0x140   : > { %v1266_v52 = vpop.f32.mrb[8].mxu0  ;;  %1425 = vmatprep.subr.bf16.mxu1 %v1424_v51 }
 0x141   : > { %1427 = vmatpush3.bf16.msra.mxu1 %v1424_v51  ;;  %632 = vrot.lane.b32.xlu1 %v1266_v52, %s1635_s8  ;;  %v382_v53 = vpop.f32.mrb[9].mxu0 }
 0x142   : > { %v1428_v54 = vpack.c.bf16 %v1266_v52, %v382_v53  ;;  %622 = vrot.lane.b32.xlu0 %v362_v47, %s1635_s8 }
 0x144   : > { %v1269_v55 = vpop.f32.mrb[10].mxu0  ;;  %1429 = vmatprep.subr.bf16.mxu1 %v1428_v54 }
 0x145   : > { %1431 = vmatpush3.bf16.msra.mxu1 %v1428_v54  ;;  %636 = vrot.lane.b32.xlu1 %v1269_v55, %s1635_s8  ;;  %v392_v56 = vpop.f32.mrb[11].mxu0 }
 0x146   : > { %v1432_v57 = vpack.c.bf16 %v1269_v55, %v392_v56  ;;  %628 = vrot.lane.b32.xlu0 %v1263_v49, %s1635_s8 }
 0x148   : > { %v1272_v58 = vpop.f32.mrb[12].mxu0  ;;  %1433 = vmatprep.subr.bf16.mxu1 %v1432_v57 }
 0x149   : > { %634 = vrot.lane.b32.xlu1 %v392_v56, %s1635_s8  ;;  %v402_v59 = vpop.f32.mrb[13].mxu0  ;;  %1435 = vmatpush3.bf16.msra.mxu1 %v1432_v57 }
 0x14a   : > { %v1436_v60 = vpack.c.bf16 %v1272_v58, %v402_v59  ;;  %626 = vrot.lane.b32.xlu0 %v372_v50, %s1635_s8 }
 0x14c   : > { %v1275_v61 = vpop.f32.mrb[14].mxu0  ;;  %1437 = vmatprep.subr.bf16.mxu1 %v1436_v60 }
 0x14d   : > { %640 = vrot.lane.b32.xlu1 %v1272_v58, %s1635_s8  ;;  %v412_v62 = vpop.f32.mrb[15].mxu0  ;;  %1439 = vmatpush3.bf16.msra.mxu1 %v1436_v60 }
 0x14e   : > { %v1440_v63 = vpack.c.bf16 %v1275_v61, %v412_v62  ;;  %630 = vrot.lane.b32.xlu0 %v382_v53, %s1635_s8 }
 0x150   : > { %1441 = vmatprep.subr.bf16.mxu1 %v1440_v63 }
 0x151   : > { %638 = vrot.lane.b32.xlu1 %v402_v59, %s1635_s8  ;;  %1443 = vmatpush3.bf16.msra.mxu1 %v1440_v63 }
 0x152   : > { %1468 = vmatprep.subr.bf16.mxu1 %v1444_v9 }
 0x154   : > { %1309 = vmatmul.mubr.f32.vlgmr.msra.gmra.mrb[0].mxu1 %v1826_v25  ;;  %v237_v25 = vld [vmem:[#allocation2 + $0x30] sm:$0xff] }
 0x155   : > { %644 = vrot.lane.b32.xlu1 %v1275_v61, %s1635_s8  ;;  %1311 = vmatprep.mubr.f32.mxu1 %v1829_v26  ;;  %v238_v26 = vld [vmem:[#allocation2 + $0x38] sm:$0xff] }
 0x156   : > { %1474 = vmatpush3.bf16.msra.mxu1 %v1444_v9 }
 0x157   : > { %1469 = vmatprep.subr.bf16.mxu1 %v1448_v15 }
 0x158   : > { %1312 = vmatmul.mubr.f32.gmra.mrb[2].mxu1 %v1834_v27  ;;  %v1456_v27 = vpack.c.bf16 %v238_v26, %v237_v25 }
 0x159   : > { %642 = vrot.lane.b32.xlu1 %v412_v62, %s1635_s8  ;;  %1314 = vmatprep.mubr.f32.mxu1 %v1837_v28  ;;  %v239_v28 = vld [vmem:[#allocation2 + $0x40] sm:$0xff] }
 0x15a   : > { %1475 = vmatpush3.bf16.msra.mxu1 %v1448_v15  ;;  %1457 = vmatprep.subr.bf16.mxu0 %v1456_v27 }
 0x15b   : > { %1470 = vmatprep.subr.bf16.mxu1 %v1452_v24  ;;  %1459 = vmatpush3.bf16.msra.mxu0 %v1456_v27 }
 0x15c   : > { %1315 = vmatmul.mubr.f32.gmra.mrb[4].mxu1 %v1842_v29  ;;  %v240_v29 = vld [vmem:[#allocation2 + $0x48] sm:$0xff] }
 0x15d   : > { %1317 = vmatprep.mubr.f32.mxu1 %v1845_v30  ;;  %v1460_v30 = vpack.c.bf16 %v240_v29, %v239_v28 }
 0x15e   : > { %1476 = vmatpush3.bf16.msra.mxu1 %v1452_v24 }
 0x15f   : > { %1471 = vmatprep.subr.bf16.mxu1 %v1456_v27  ;;  %1461 = vmatprep.subr.bf16.mxu0 %v1460_v30 }
 0x160   : > { %1318 = vmatmul.mubr.f32.gmra.mrb[6].mxu1 %v1850_v31  ;;  %1463 = vmatpush3.bf16.msra.mxu0 %v1460_v30  ;;  %v241_v31 = vld [vmem:[#allocation2 + $0x50] sm:$0xff] }
 0x161   : > { %1320 = vmatprep.mubr.f32.mxu1 %v1853_v32  ;;  %v242_v32 = vld [vmem:[#allocation2 + $0x58] sm:$0xff] }
 0x162   : > { %1477 = vmatpush3.bf16.msra.mxu1 %v1456_v27 }
 0x163   : > { %1472 = vmatprep.subr.bf16.mxu1 %v1460_v30 }
 0x164   : > { %1321 = vmatmul.mubr.f32.gmra.mrb[8].mxu1 %v1858_v33  ;;  %v1464_v33 = vpack.c.bf16 %v242_v32, %v241_v31 }
 0x165   : > { %1323 = vmatprep.mubr.f32.mxu1 %v1861_v34 }
 0x166   : > { %1478 = vmatpush3.bf16.msra.mxu1 %v1460_v30  ;;  %1465 = vmatprep.subr.bf16.mxu0 %v1464_v33 }
 0x167   : > { %1473 = vmatprep.subr.bf16.mxu1 %v1464_v33  ;;  %1467 = vmatpush3.bf16.msra.mxu0 %v1464_v33 }
 0x168   : > { %1324 = vmatmul.mubr.f32.gmra.mrb[10].mxu1 %v1866_v35 }
 0x169   : > { %1326 = vmatprep.mubr.f32.mxu1 %v1869_v36 }
 0x16a   : > { %1479 = vmatpush3.bf16.msra.mxu1 %v1464_v33 }
 0x16c   : > { %1327 = vmatmul.mubr.f32.gmra.mrb[12].mxu1 %v1874_v37 }
 0x16d   : > { %1329 = vmatprep.mubr.f32.mxu1 %v1877_v38 }
 0x170   : > { %1330 = vmatmul.mubr.f32.gmra.mrb[14].mxu1 %v1882_v39 }
 0x227   : > { %v1310_v34 = vpop.f32.mrb[0].mxu1 }
 0x228   : > { %v567_v35 = vmul.f32 2.0, %v1310_v34  ;;  %v487_v36 = vpop.f32.mrb[1].mxu1  ;;  %v615_v34 = vpop.permute.xlu0 %614 }
 0x229   : > { %v566_v38 = vmul.f32 2.0, %v487_v36 }
 0x22a   : > { %v583_v37 = vsub.f32 %v567_v35, %v1759_v1 }
 0x22b   : > { %v1313_v39 = vpop.f32.mrb[2].mxu1  ;;  %v582_v41 = vsub.f32 %v566_v38, %v1756_v0 }
 0x22c   : > { %680 = vrot.lane.b32.xlu0 %v583_v37, %s1636_s9  ;;  %v497_v40 = vpop.f32.mrb[3].mxu1  ;;  %v569_v42 = vmul.f32 2.0, %v1313_v39  ;;  %v621_v35 = vpop.permute.xlu0 %620 }
 0x22d   : > { %v568_v46 = vmul.f32 2.0, %v497_v40  ;;  %v617_v37 = vpop.permute.xlu1 %616 }
 0x22e   : > { %v585_v45 = vsub.f32 %v569_v42, %v1767_v4 }
 0x22f   : > { %v1316_v43 = vpop.f32.mrb[4].mxu1  ;;  %v584_v49 = vsub.f32 %v568_v46, %v1762_v2 }
 0x230   : > { %678 = vrot.lane.b32.xlu0 %v582_v41, %s1636_s9  ;;  %v507_v44 = vpop.f32.mrb[5].mxu1  ;;  %v571_v50 = vmul.f32 2.0, %v1316_v43  ;;  %v619_v36 = vpop.permute.xlu0 %618 }
 0x231   : > { %v570_v55 = vmul.f32 2.0, %v507_v44  ;;  %v633_v39 = vpop.permute.xlu1 %632 }
 0x232   : > { %v587_v54 = vsub.f32 %v571_v50, %v1775_v7 }
 0x233   : > { %v1319_v47 = vpop.f32.mrb[6].mxu1  ;;  %v586_v61 = vsub.f32 %v570_v55, %v1772_v6 }
 0x234   : > { %684 = vrot.lane.b32.xlu0 %v585_v45, %s1636_s9  ;;  %v517_v48 = vpop.f32.mrb[7].mxu1  ;;  %v573_v9 = vmul.f32 2.0, %v1319_v47  ;;  %v625_v38 = vpop.permute.xlu0 %624 }
 0x235   : > { %v572_v62 = vmul.f32 2.0, %v517_v48  ;;  %v637_v41 = vpop.permute.xlu1 %636 }
 0x236   : > { %v589_v25 = vsub.f32 %v573_v9, %v1789_v11 }
 0x237   : > { %v1322_v51 = vpop.f32.mrb[8].mxu1  ;;  %v588_v12 = vsub.f32 %v572_v62, %v1786_v10 }
 0x238   : > { %v575_v52 = vmul.f32 2.0, %v1322_v51  ;;  %682 = vrot.lane.b32.xlu0 %v584_v49, %s1636_s9  ;;  %v527_v53 = vpop.f32.mrb[9].mxu1  ;;  %v623_v40 = vpop.permute.xlu0 %622  ;;  %v727_v49 = vsel %vm726_vm0, %v1756_v0, %v615_v34  ;;  %v728_v51 = vsel %vm726_vm0, %v1759_v1, %v617_v37  ;;  %v730_v0 = vsel %vm726_vm0, %v1767_v4, %v621_v35 }
 0x239   : > { %v574_v57 = vmul.f32 2.0, %v527_v53  ;;  %v635_v43 = vpop.permute.xlu1 %634  ;;  %v731_v62 = vsel %vm726_vm0, %v1772_v6, %v623_v40  ;;  %v732_v4 = vsel %vm726_vm0, %v1775_v7, %v625_v38 }
 0x23a   : > { %v591_v56 = vsub.f32 %v575_v52, %v1797_v14 }
 0x23b   : > { %v1325_v58 = vpop.f32.mrb[10].mxu1  ;;  %v590_v63 = vsub.f32 %v574_v57, %v1794_v13 }
 0x23c   : > { %688 = vrot.lane.b32.xlu0 %v587_v54, %s1636_s9  ;;  %696 = vrot.lane.b32.xlu1 %v591_v56, %s1636_s9  ;;  %v577_v59 = vmul.f32 2.0, %v1325_v58  ;;  %v537_v60 = vpop.f32.mrb[11].mxu1  ;;  %v629_v42 = vpop.permute.xlu0 %628  ;;  %v729_v56 = vsel %vm726_vm0, %v1762_v2, %v619_v36  ;;  %v2016_v36 = vld [vmem:[%s2109_s3] ss:$0 sm:$0xff] }
 0x23d   : > { %v576_v15 = vmul.f32 2.0, %v537_v60  ;;  %v641_v45 = vpop.permute.xlu1 %640 }
 0x23e   : > { %v593_v5 = vsub.f32 %v577_v59, %v1805_v17 }
 0x23f   : > { %v1328_v3 = vpop.f32.mrb[12].mxu1  ;;  %v592_v26 = vsub.f32 %v576_v15, %v1802_v16 }
 0x240   : > { %686 = vrot.lane.b32.xlu0 %v586_v61, %s1636_s9  ;;  %694 = vrot.lane.b32.xlu1 %v590_v63, %s1636_s9  ;;  %v547_v8 = vpop.f32.mrb[13].mxu1  ;;  %v579_v21 = vmul.f32 2.0, %v1328_v3  ;;  %v627_v44 = vpop.permute.xlu0 %626 }
 0x241   : > { %v578_v28 = vmul.f32 2.0, %v547_v8  ;;  %v639_v47 = vpop.permute.xlu1 %638  ;;  %v733_v6 = vsel %vm726_vm0, %v1786_v10, %v627_v44 }
 0x242   : > { %v595_v27 = vsub.f32 %v579_v21, %v1813_v20  ;;  %v737_v21 = vsel %vm726_vm0, %v1802_v16, %v635_v43  ;;  %v739_v16 = vsel %vm726_vm0, %v1810_v19, %v639_v47 }
 0x243   : > { %v1331_v18 = vpop.f32.mrb[14].mxu1  ;;  %v594_v30 = vsub.f32 %v578_v28, %v1810_v19 }
 0x244   : > { %690 = vrot.lane.b32.xlu0 %v588_v12, %s1636_s9  ;;  %700 = vrot.lane.b32.xlu1 %v593_v5, %s1636_s9  ;;  %v557_v24 = vpop.f32.mrb[15].mxu1  ;;  %v581_v32 = vmul.f32 2.0, %v1331_v18  ;;  %v631_v46 = vpop.permute.xlu0 %630  ;;  %v736_v5 = vsel %vm726_vm0, %v1797_v14, %v633_v39  ;;  %v734_v18 = vsel %vm726_vm0, %v1789_v11, %v629_v42 }
 0x245   : > { %v580_v29 = vmul.f32 2.0, %v557_v24  ;;  %v645_v53 = vpop.permute.xlu1 %644  ;;  %v735_v2 = vsel %vm726_vm0, %v1794_v13, %v631_v46 }
 0x246   : > { %v597_v33 = vsub.f32 %v581_v32, %v1821_v23  ;;  %v742_v19 = vsel %vm726_vm0, %v1821_v23, %v645_v53 }
 0x247   : > { %v596_v31 = vsub.f32 %v580_v29, %v1818_v22 }
 0x248   : > { %692 = vrot.lane.b32.xlu0 %v589_v25, %s1636_s9  ;;  %698 = vrot.lane.b32.xlu1 %v592_v26, %s1636_s9  ;;  %v738_v26 = vsel %vm726_vm0, %v1805_v17, %v637_v41  ;;  %v740_v17 = vsel %vm726_vm0, %v1813_v20, %v641_v45 }
 0x249   : > { %v643_v57 = vpop.permute.xlu1 %642 }
 0x24a   : > { %v741_v32 = vsel %vm726_vm0, %v1818_v22, %v643_v57 }
 0x24c   : > { %704 = vrot.lane.b32.xlu1 %v595_v27, %s1636_s9 }
 0x250   : > { %702 = vrot.lane.b32.xlu1 %v594_v30, %s1636_s9 }
 0x254   : > { %706 = vrot.lane.b32.xlu1 %v596_v31, %s1636_s9 }
 0x258   : > { %708 = vrot.lane.b32.xlu1 %v597_v33, %s1636_s9 }
 0x29e   : > { %v681_v48 = vpop.permute.xlu0 %680 }
 0x29f   : > { %v745_v54 = vsel %vm743_vm1, %v728_v51, %v681_v48 }
 0x2a2   : > { %v679_v50 = vpop.permute.xlu0 %678 }
 0x2a3   : > { %v744_v52 = vsel %vm743_vm1, %v727_v49, %v679_v50 }
 0x2a4   : > { %1356 = vmatprep.mubr.msk.f32.mxu0 %vm766_vm2, %v744_v52 }
 0x2a5   : > { %1357 = vmatmul.mubr.msk.f32.vlgmr.msra.gmra.mrb[16].mxu0 %vm766_vm2, %v745_v54 }
 0x2a6   : > { %v685_v55 = vpop.permute.xlu0 %684 }
 0x2a7   : > { %v747_v59 = vsel %vm743_vm1, %v730_v0, %v685_v55 }
 0x2aa   : > { %v683_v58 = vpop.permute.xlu0 %682 }
 0x2ab   : > { %v746_v1 = vsel %vm743_vm1, %v729_v56, %v683_v58 }
 0x2ac   : > { %1359 = vmatprep.mubr.msk.f32.mxu0 %vm766_vm2, %v746_v1 }
 0x2ad   : > { %1360 = vmatmul.mubr.msk.f32.gmra.mrb[18].mxu0 %vm766_vm2, %v747_v59 }
 0x2ae   : > { %v689_v60 = vpop.permute.xlu0 %688  ;;  %v697_v61 = vpop.permute.xlu1 %696 }
 0x2af   : > { %v749_v12 = vsel %vm743_vm1, %v732_v4, %v689_v60  ;;  %v753_v15 = vsel %vm743_vm1, %v736_v5, %v697_v61 }
 0x2b2   : > { %v687_v63 = vpop.permute.xlu0 %686  ;;  %v695_v3 = vpop.permute.xlu1 %694 }
 0x2b3   : > { %v748_v8 = vsel %vm743_vm1, %v731_v62, %v687_v63  ;;  %v752_v9 = vsel %vm743_vm1, %v735_v2, %v695_v3 }
 0x2b4   : > { %1362 = vmatprep.mubr.msk.f32.mxu0 %vm766_vm2, %v748_v8  ;;  %1368 = vmatprep.mubr.msk.f32.mxu1 %vm766_vm2, %v752_v9 }
 0x2b5   : > { %1363 = vmatmul.mubr.msk.f32.gmra.mrb[20].mxu0 %vm766_vm2, %v749_v12  ;;  %1369 = vmatmul.mubr.msk.f32.vlgmr.msra.gmra.mrb[16].mxu1 %vm766_vm2, %v753_v15 }
 0x2b6   : > { %v691_v7 = vpop.permute.xlu0 %690  ;;  %v701_v13 = vpop.permute.xlu1 %700 }
 0x2b7   : > { %v750_v14 = vsel %vm743_vm1, %v733_v6, %v691_v7  ;;  %v755_v28 = vsel %vm743_vm1, %v738_v26, %v701_v13 }
 0x2b8   : > { %1365 = vmatprep.mubr.msk.f32.mxu0 %vm766_vm2, %v750_v14 }
 0x2ba   : > { %v693_v24 = vpop.permute.xlu0 %692  ;;  %v699_v25 = vpop.permute.xlu1 %698 }
 0x2bb   : > { %v751_v27 = vsel %vm743_vm1, %v734_v18, %v693_v24  ;;  %v754_v10 = vsel %vm743_vm1, %v737_v21, %v699_v25 }
 0x2bc   : > { %1366 = vmatmul.mubr.msk.f32.gmra.mrb[22].mxu0 %vm766_vm2, %v751_v27  ;;  %1371 = vmatprep.mubr.msk.f32.mxu1 %vm766_vm2, %v754_v10 }
 0x2bd   : > { %1372 = vmatmul.mubr.msk.f32.gmra.mrb[18].mxu1 %vm766_vm2, %v755_v28 }
 0x2be   : > { %v705_v11 = vpop.permute.xlu1 %704 }
 0x2bf   : > { %v757_v31 = vsel %vm743_vm1, %v740_v17, %v705_v11 }
 0x2c2   : > { %v703_v29 = vpop.permute.xlu1 %702 }
 0x2c3   : > { %v756_v30 = vsel %vm743_vm1, %v739_v16, %v703_v29 }
 0x2c4   : > { %1374 = vmatprep.mubr.msk.f32.mxu1 %vm766_vm2, %v756_v30 }
 0x2c5   : > { %1375 = vmatmul.mubr.msk.f32.gmra.mrb[20].mxu1 %vm766_vm2, %v757_v31 }
 0x2c6   : > { %v707_v33 = vpop.permute.xlu1 %706 }
 0x2c7   : > { %v758_v34 = vsel %vm743_vm1, %v741_v32, %v707_v33 }
 0x2c8   : > { %1377 = vmatprep.mubr.msk.f32.mxu1 %vm766_vm2, %v758_v34 }
 0x2ca   : > { %v709_v20 = vpop.permute.xlu1 %708 }
 0x2cb   : > { %v759_v35 = vsel %vm743_vm1, %v742_v19, %v709_v20 }
 0x2cc   : > { %1378 = vmatmul.mubr.msk.f32.gmra.mrb[22].mxu1 %vm766_vm2, %v759_v35 }
 0x378   : > { %v1358_v22 = vpop.f32.mrb[16].mxu0 }
 0x379   : > { %v887_v37 = vadd.f32 %v1358_v22, %v2016_v36  ;;  %v881_v38 = vpop.f32.mrb[17].mxu0 }
 0x37a   : > { %v882_v39 = vadd.f32 %v2016_v36, %v881_v38 }
 0x37b   : > { %v961_v23 = vmax.f32 %v887_v37, 0.0 }
 0x37c   : > { %v960_v40 = vmax.f32 %v882_v39, 0.0 }
 0x37d   : > { %977 = vst [vmem:[%s2022_s14 + $0x8] sm:$0xff] %v961_v23 }
 0x37e   : > { %976 = vst [vmem:[%s2022_s14] sm:$0xff] %v960_v40 }
 0x380   : > { %v1361_v41 = vpop.f32.mrb[18].mxu0 }
 0x381   : > { %v897_v42 = vadd.f32 %v1361_v41, %v2016_v36  ;;  %v891_v43 = vpop.f32.mrb[19].mxu0 }
 0x382   : > { %v892_v44 = vadd.f32 %v2016_v36, %v891_v43 }
 0x383   : > { %v963_v45 = vmax.f32 %v897_v42, 0.0 }
 0x384   : > { %v962_v46 = vmax.f32 %v892_v44, 0.0 }
 0x385   : > { %979 = vst [vmem:[%s2022_s14 + $0x18] sm:$0xff] %v963_v45 }
 0x386   : > { %978 = vst [vmem:[%s2022_s14 + $0x10] sm:$0xff] %v962_v46 }
 0x388   : > { %v1364_v47 = vpop.f32.mrb[20].mxu0  ;;  %v1370_v48 = vpop.f32.mrb[16].mxu1 }
 0x389   : > { %v907_v49 = vadd.f32 %v1364_v47, %v2016_v36  ;;  %v927_v50 = vadd.f32 %v1370_v48, %v2016_v36  ;;  %v901_v51 = vpop.f32.mrb[21].mxu0  ;;  %v921_v52 = vpop.f32.mrb[17].mxu1 }
 0x38a   : > { %v902_v53 = vadd.f32 %v2016_v36, %v901_v51  ;;  %v922_v54 = vadd.f32 %v2016_v36, %v921_v52 }
 0x38b   : > { %v965_v55 = vmax.f32 %v907_v49, 0.0  ;;  %v969_v56 = vmax.f32 %v927_v50, 0.0 }
 0x38c   : > { %v964_v57 = vmax.f32 %v902_v53, 0.0  ;;  %v968_v58 = vmax.f32 %v922_v54, 0.0 }
 0x38d   : > { %981 = vst [vmem:[%s2022_s14 + $0x28] sm:$0xff] %v965_v55  ;;  %985 = vst [vmem:[%s2022_s14 + $0x48] sm:$0xff] %v969_v56 }
 0x38e   : > { %980 = vst [vmem:[%s2022_s14 + $0x20] sm:$0xff] %v964_v57  ;;  %984 = vst [vmem:[%s2022_s14 + $0x40] sm:$0xff] %v968_v58 }
 0x38f   : > { %v1367_v0 = vpop.f32.mrb[22].mxu0 }
 0x390   : > { %v917_v1 = vadd.f32 %v1367_v0, %v2016_v36  ;;  %v911_v59 = vpop.f32.mrb[23].mxu0  ;;  %v1373_v60 = vpop.f32.mrb[18].mxu1 }
 0x391   : > { %v912_v61 = vadd.f32 %v2016_v36, %v911_v59  ;;  %v937_v62 = vadd.f32 %v1373_v60, %v2016_v36  ;;  %v931_v2 = vpop.f32.mrb[19].mxu1 }
 0x392   : > { %v967_v63 = vmax.f32 %v917_v1, 0.0  ;;  %v932_v3 = vadd.f32 %v2016_v36, %v931_v2 }
 0x393   : > { %v966_v4 = vmax.f32 %v912_v61, 0.0  ;;  %v971_v5 = vmax.f32 %v937_v62, 0.0 }
 0x394   : > { %983 = vst [vmem:[%s2022_s14 + $0x38] sm:$0xff] %v967_v63  ;;  %v970_v8 = vmax.f32 %v932_v3, 0.0 }
 0x395   : > { %982 = vst [vmem:[%s2022_s14 + $0x30] sm:$0xff] %v966_v4  ;;  %987 = vst [vmem:[%s2022_s14 + $0x58] sm:$0xff] %v971_v5 }
 0x396   : > { %986 = vst [vmem:[%s2022_s14 + $0x50] sm:$0xff] %v970_v8 }
 0x398   : > { %v1376_v9 = vpop.f32.mrb[20].mxu1 }
 0x399   : > { %v947_v12 = vadd.f32 %v1376_v9, %v2016_v36  ;;  %v941_v15 = vpop.f32.mrb[21].mxu1 }
 0x39a   : > { %v942_v6 = vadd.f32 %v2016_v36, %v941_v15 }
 0x39b   : > { %v973_v7 = vmax.f32 %v947_v12, 0.0 }
 0x39c   : > { %v972_v13 = vmax.f32 %v942_v6, 0.0 }
 0x39d   : > { %989 = vst [vmem:[%s2022_s14 + $0x68] sm:$0xff] %v973_v7 }
 0x39e   : > { %988 = vst [vmem:[%s2022_s14 + $0x60] sm:$0xff] %v972_v13 }
 0x39f   : > { %v1379_v14 = vpop.f32.mrb[22].mxu1 }
 0x3a0   : > { %v957_v18 = vadd.f32 %v1379_v14, %v2016_v36  ;;  %v951_v21 = vpop.f32.mrb[23].mxu1 }
 0x3a1   : > { %v952_v24 = vadd.f32 %v2016_v36, %v951_v21 }
 0x3a2   : > { %v975_v25 = vmax.f32 %v957_v18, 0.0 }
 0x3a3   : > { %v974_v26 = vmax.f32 %v952_v24, 0.0 }
 0x3a4   : > { %991 = vst [vmem:[%s2022_s14 + $0x78] sm:$0xff] %v975_v25 }
 0x3a5   : > { %990 = vst [vmem:[%s2022_s14 + $0x70] sm:$0xff] %v974_v26 }
 0x3a6   : > { %1577 = shalt.err (!%p1574_p7)
}
 0x3a7   : > { %s1578_s7 = scalar_lea.hbm %s2057_s5, 2048  ;;  %s1582_s10 = scalar_lea.hbm %s2110_s4, 4096 }
 0x3a8   : > { %p1579_p8 = scmp.ne.s32.totalorder %s2057_s5, %s1578_s7  ;;  %p1583_p1 = scmp.lt.u32.totalorder %s2057_s5, %s2110_s4 }
 0x3a9   : > { %p1584_p0 = scmp.lt.u32.totalorder %s1582_s10, %s1578_s7  ;;  %p1586_p6 = scmp.lt.u32.totalorder %s1578_s7, %s2057_s5 }
 0x3aa   : > { %p1580_p11 = pnand %p1579_p8, %p2121_p9 }
 0x3ab   : > { %p1585_p5 = por %p1584_p0, %p1583_p1 }
 0x3ac   : > { %p1581_p13 = pneg %p1580_p11 }
 0x3ad   : > { %p1587_p10 = por %p1586_p6, %p1585_p5 }
 0x3af   : > { %p1588_p12 = pnand %p1587_p10, %p1581_p13 }
 0x3b1   : > { %1591 = shalt.err (!%p1588_p12)
}
 0x3b2   : > { %s1638_s13 = smov 128   ;;  %s1639_s14 = smov 8  }
 0x3b3   : > { %1484 = dma.vmem_to_hbm [thread:$0]  (%p2121_p9), %s2059_s22, 2048, %s2057_s5, %s2065_s19, %s1638_s13, %s1638_s13, %s1639_s14  }
 0x3b4 PF: > { %p1496_p2 = scmp.ge.s32.totalorder %s1630_s18, 2  ;;  %s1021_s20 = sand.u32 1, %s1618_s15  }
 0x3b5   : > { %p2122_p3 = scmp.ne.s32.totalorder %s2115_s26, 0  ;;  %s1022_s23 = scalar_lea.sflag [#allocation4], %s1021_s20 }
 0x3b7   : > { %p1491_p4 = pnand %p1496_p2, %p2122_p3 }
 0x3b9   : > { %1613 = dma.done.wait (!%p1491_p4), %s1022_s23, 2048  }
 0x3ba   : > { %1615 = vsyncadd (!%p1491_p4), %s1022_s23, 4294965248  ;;  %p15_p7 = scmp.ge.s32.totalorder %s1690_s21, 4   ;;  %s2123_s15 = smov %s1622_s16 }
 0x3bb   : > { %s2124_s16 = smov %s1626_s17  ;;  %s2125_s17 = smov %s1701_s24 }
 0x3bc   : > { %s2126_s18 = smov %s1690_s21  ;;  %17 = sbr.rel (!%p15_p7) target bundleno = 4 (0x4), region = 79 }
 0x3c3   :  { %1027 = vsyncpa [#allocation3], 1 }
 0x3c4   :  { %1029 = vsyncpa [#allocation3 + $0x1], 1 }
 0x3c5   :  { %1030 = vsyncpa [#allocation4], 1 }
 0x3c6   :  { %1032 = vsyncpa [#allocation4 + $0x1], 1 }

</bundles_post_ra>
